<compile_context>
chip_gen: v7x
topology: tpu7x:2x2x1
jax: 0.10.0
libtpu: 0.0.40
codegen_flags: <defaults>
</compile_context>

<pallas_src>
import jax
import jax.numpy as jnp
from jax.experimental import pallas as pl
from jax.experimental.pallas import tpu as pltpu

H1 = 256          # hidden width of input1 / input2
H2 = 512          # hidden width of fc1 / fc2
MAX_TILE_B = 512  # upper bound on the batch tile


def _critic_kernel(
    xu_ref,                       # (TILE_B, S+A) bf16 — pre-concatenated state|action
    w1_ref, b1_ref,               # fused layer 1: (S+A, 2*H1) bf16, (1, 2*H1) f32
    w2a_ref, b2a_ref,             # branch-1 layer 2: (H1, H2) bf16, (1, H2) f32
    w2b_ref, b2b_ref,             # branch-2 layer 2
    w3a_ref, w3b_ref, b3_ref,     # layer 3 rows: (1, H2) f32 each, (1, 2) f32
    out_ref,                      # (TILE_B, 2) f32: lane 0 = value1, lane 1 = value2
):
    xu = xu_ref[...]

    # Fused first layer of BOTH branches: one bf16 matmul, f32 accumulation.
    h0 = jnp.dot(xu, w1_ref[...], preferred_element_type=jnp.float32) + b1_ref[...]
    h0 = jnp.maximum(h0, 0.0)                        # (B, 2*H1) f32

    # Lane split at 256 (128-multiple boundary -> no relayout); cast for MXU.
    h1 = h0[:, :H1].astype(jnp.bfloat16)             # branch 1
    g1 = h0[:, H1:].astype(jnp.bfloat16)             # branch 2

    h2 = jnp.maximum(
        jnp.dot(h1, w2a_ref[...], preferred_element_type=jnp.float32) + b2a_ref[...],
        0.0)                                         # (B, H2) f32
    g2 = jnp.maximum(
        jnp.dot(g1, w2b_ref[...], preferred_element_type=jnp.float32) + b2b_ref[...],
        0.0)                                         # (B, H2) f32

    # Output projections on the VPU (broadcast-mul) + XLU (lane reduction)
    # instead of wasting MXU streaming on an N=2 matmul.
    v1 = jnp.sum(h2 * w3a_ref[...], axis=-1, keepdims=True)   # (B, 1)
    v2 = jnp.sum(g2 * w3b_ref[...], axis=-1, keepdims=True)   # (B, 1)
    v = jnp.concatenate([v1, v2], axis=-1) + b3_ref[...]      # (B, 2)
    out_ref[...] = v.astype(out_ref.dtype)


def _round_up(n, m):
    return ((n + m - 1) // m) * m


@jax.jit
def critic_forward(x, u, fparams):
    """CriticNet.forward(x, u) -> (value1, value2), using fused params."""
    batch = x.shape[0]
    in_dim = x.shape[1] + u.shape[1]

    # Concat in the wrapper (removes the second in-kernel dot) and cast to
    # bf16 (halves x/u DMA bytes; MXU operands are bf16 anyway).
    xu = jnp.concatenate([x, u], axis=1).astype(jnp.bfloat16)

    # Balanced batch tiles: avoid huge last-tile padding; force >= 2 grid
    # steps once the batch is large enough so the "parallel" axis can use
    # both v7x TensorCores (an extra ~0.35us step elsewhere — negligible).
    n_tiles = pl.cdiv(batch, MAX_TILE_B)
    if batch >= 256:
        n_tiles = max(n_tiles, 2)
    tile_b = _round_up(pl.cdiv(batch, n_tiles), 8)
    b_pad = n_tiles * tile_b
    if b_pad != batch:
        xu = jnp.pad(xu, ((0, b_pad - batch), (0, 0)))

    def tiled(shape):
        return pl.BlockSpec(shape, lambda i: (i, 0))

    def resident(arr):
        # Same block every grid step -> weights stay parked in VMEM.
        return pl.BlockSpec(arr.shape, lambda i: (0, 0))

    order = ["w1", "b1", "w2a", "b2a", "w2b", "b2b", "w3a", "w3b", "b3"]
    weights = [fparams[k] for k in order]

    out = pl.pallas_call(
        _critic_kernel,
        out_shape=jax.ShapeDtypeStruct((b_pad, 2), jnp.float32),
        grid=(n_tiles,),
        in_specs=[tiled((tile_b, in_dim))] + [resident(w) for w in weights],
        out_specs=tiled((tile_b, 2)),
        compiler_params=pltpu.CompilerParams(
            dimension_semantics=("parallel",)),
    )(xu, *weights)

    out = out[:batch]
    return out[:, 0:1], out[:, 1:2]


def init_params(key, state_num, action_num):
    """PyTorch-style init: U(-1/sqrt(fan_in), 1/sqrt(fan_in)), f32 masters.

    Weights stored (in_features, out_features); biases (1, out_features).
    """
    in_dim = state_num + action_num
    dims = [
        ("w1a", "b1a", in_dim, H1),
        ("w2a", "b2a", H1, H2),
        ("w3a", "b3a", H2, 1),
        ("w1b", "b1b", in_dim, H1),
        ("w2b", "b2b", H1, H2),
        ("w3b", "b3b", H2, 1),
    ]
    params = {}
    for wname, bname, fan_in, fan_out in dims:
        key, kw, kb = jax.random.split(key, 3)
        bound = 1.0 / (fan_in ** 0.5)
        params[wname] = jax.random.uniform(
            kw, (fan_in, fan_out), jnp.float32, -bound, bound)
        params[bname] = jax.random.uniform(
            kb, (1, fan_out), jnp.float32, -bound, bound)
    return params


def fuse_params(params):
    """Pre-fuse per-branch weights into the kernel's layout (re-run after any
    optimizer step — stale fused weights would silently give wrong Q-values)."""
    w1 = jnp.concatenate([params["w1a"], params["w1b"]], axis=1)       # (in, 2*H1)
    b1 = jnp.concatenate([params["b1a"], params["b1b"]], axis=1)       # (1, 2*H1)
    return {
        "w1": w1.astype(jnp.bfloat16),
        "b1": b1,                                                      # f32
        "w2a": params["w2a"].astype(jnp.bfloat16), "b2a": params["b2a"],
        "w2b": params["w2b"].astype(jnp.bfloat16), "b2b": params["b2b"],
        "w3a": params["w3a"].T,                                        # (1, H2) f32
        "w3b": params["w3b"].T,                                        # (1, H2) f32
        "b3": jnp.concatenate([params["b3a"], params["b3b"]], axis=1), # (1, 2)
    }


def reference_forward(x, u, params):
    """Pure-JAX f32 reference (mirrors the PyTorch module) for correctness."""
    xu = jnp.concatenate([x, u], axis=1)
    h = jnp.maximum(xu @ params["w1a"] + params["b1a"], 0.0)
    h = jnp.maximum(h @ params["w2a"] + params["b2a"], 0.0)
    v1 = h @ params["w3a"] + params["b3a"]
    g = jnp.maximum(xu @ params["w1b"] + params["b1b"], 0.0)
    g = jnp.maximum(g @ params["w2b"] + params["b2b"], 0.0)
    v2 = g @ params["w3b"] + params["b3b"]
    return v1, v2


if __name__ == "__main__":
    state_num, action_num = 8, 4

    key = jax.random.PRNGKey(0)
    key, kp = jax.random.split(key)
    params = init_params(kp, state_num, action_num)
    fparams = fuse_params(params)

    # Small-shape check (matches the module demo), a 2-tile check (batch just
    # over 256), and a multi-tile balanced-padding check (1030 -> 3 x 344).
    for batch in (2, 300, 1030):
        key, kx, ku = jax.random.split(key, 3)
        x = jax.random.normal(kx, (batch, state_num), jnp.float32)
        u = jax.random.normal(ku, (batch, action_num), jnp.float32)

        v1, v2 = critic_forward(x, u, fparams)
        jax.block_until_ready((v1, v2))

        r1, r2 = reference_forward(x, u, params)
        assert v1.shape == (batch, 1) and v2.shape == (batch, 1)
        # bf16 MXU operands -> loosened tolerance vs the f32 reference.
        assert jnp.allclose(v1, r1, atol=2e-2, rtol=2e-2)
        assert jnp.allclose(v2, r2, atol=2e-2, rtol=2e-2)

    print("KERNEL_OK")
</pallas_src>

<mosaic_0001>
module attributes {stable_mosaic.version = 11 : i64} {
  func.func @_critic_kernel(%arg0: i32, %arg1: memref<8x12xbf16, #tpu.memory_space<vmem>>, %arg2: memref<12x512xbf16, #tpu.memory_space<vmem>>, %arg3: memref<1x512xf32, #tpu.memory_space<vmem>>, %arg4: memref<256x512xbf16, #tpu.memory_space<vmem>>, %arg5: memref<1x512xf32, #tpu.memory_space<vmem>>, %arg6: memref<256x512xbf16, #tpu.memory_space<vmem>>, %arg7: memref<1x512xf32, #tpu.memory_space<vmem>>, %arg8: memref<1x512xf32, #tpu.memory_space<vmem>>, %arg9: memref<1x512xf32, #tpu.memory_space<vmem>>, %arg10: memref<1x2xf32, #tpu.memory_space<vmem>>, %arg11: memref<8x2xf32, #tpu.memory_space<vmem>>) attributes {dimension_semantics = [#tpu.dimension_semantics<parallel>], iteration_bounds = array<i64: 1>, scalar_prefetch = 0 : i64, scratch_operands = 0 : i64, tpu.core_type = #tpu.core_type<tc>, window_params = [{transform_indices = @transform_0, window_bounds = array<i64: 8, 12>}, {pipeline_mode = #tpu.pipeline_mode<synchronous>, transform_indices = @transform_1, window_bounds = array<i64: 12, 512>}, {pipeline_mode = #tpu.pipeline_mode<synchronous>, transform_indices = @transform_2, window_bounds = array<i64: 1, 512>}, {pipeline_mode = #tpu.pipeline_mode<synchronous>, transform_indices = @transform_3, window_bounds = array<i64: 256, 512>}, {pipeline_mode = #tpu.pipeline_mode<synchronous>, transform_indices = @transform_4, window_bounds = array<i64: 1, 512>}, {pipeline_mode = #tpu.pipeline_mode<synchronous>, transform_indices = @transform_5, window_bounds = array<i64: 256, 512>}, {pipeline_mode = #tpu.pipeline_mode<synchronous>, transform_indices = @transform_6, window_bounds = array<i64: 1, 512>}, {pipeline_mode = #tpu.pipeline_mode<synchronous>, transform_indices = @transform_7, window_bounds = array<i64: 1, 512>}, {pipeline_mode = #tpu.pipeline_mode<synchronous>, transform_indices = @transform_8, window_bounds = array<i64: 1, 512>}, {pipeline_mode = #tpu.pipeline_mode<synchronous>, transform_indices = @transform_9, window_bounds = array<i64: 1, 2>}, {transform_indices = @transform_10, window_bounds = array<i64: 8, 2>}]} {
    %c0 = arith.constant 0 : index
    %c0_0 = arith.constant 0 : index
    %0 = vector.load %arg1[%c0, %c0_0] : memref<8x12xbf16, #tpu.memory_space<vmem>>, vector<8x12xbf16>
    %c0_1 = arith.constant 0 : index
    %c0_2 = arith.constant 0 : index
    %1 = vector.load %arg2[%c0_1, %c0_2] : memref<12x512xbf16, #tpu.memory_space<vmem>>, vector<12x512xbf16>
    %cst = arith.constant dense<0.000000e+00> : vector<8x512xf32>
    %2 = tpu.matmul %0, %1, %cst {dimension_numbers = #tpu.dot_dimension_numbers<[1], [0], [0], [1], [0, 0, 1, 1], [], []>} : vector<8x12xbf16>, vector<12x512xbf16>, vector<8x512xf32> -> vector<8x512xf32>
    %c0_3 = arith.constant 0 : index
    %c0_4 = arith.constant 0 : index
    %3 = vector.load %arg3[%c0_3, %c0_4] : memref<1x512xf32, #tpu.memory_space<vmem>>, vector<1x512xf32>
    %4 = vector.broadcast %3 : vector<1x512xf32> to vector<8x512xf32>
    %5 = arith.addf %2, %4 : vector<8x512xf32>
    %cst_5 = arith.constant 0.000000e+00 : f32
    %6 = vector.broadcast %cst_5 : f32 to vector<8x512xf32>
    %7 = arith.maximumf %5, %6 : vector<8x512xf32>
    %8 = vector.extract_strided_slice %7 {offsets = [0, 0], sizes = [8, 256], strides = [1, 1]} : vector<8x512xf32> to vector<8x256xf32>
    %9 = arith.truncf %8 : vector<8x256xf32> to vector<8x256xbf16>
    %10 = vector.extract_strided_slice %7 {offsets = [0, 256], sizes = [8, 256], strides = [1, 1]} : vector<8x512xf32> to vector<8x256xf32>
    %11 = arith.truncf %10 : vector<8x256xf32> to vector<8x256xbf16>
    %c0_6 = arith.constant 0 : index
    %c0_7 = arith.constant 0 : index
    %12 = vector.load %arg4[%c0_6, %c0_7] : memref<256x512xbf16, #tpu.memory_space<vmem>>, vector<256x512xbf16>
    %cst_8 = arith.constant dense<0.000000e+00> : vector<8x512xf32>
    %13 = tpu.matmul %9, %12, %cst_8 {dimension_numbers = #tpu.dot_dimension_numbers<[1], [0], [0], [1], [0, 0, 1, 1], [], []>} : vector<8x256xbf16>, vector<256x512xbf16>, vector<8x512xf32> -> vector<8x512xf32>
    %c0_9 = arith.constant 0 : index
    %c0_10 = arith.constant 0 : index
    %14 = vector.load %arg5[%c0_9, %c0_10] : memref<1x512xf32, #tpu.memory_space<vmem>>, vector<1x512xf32>
    %15 = vector.broadcast %14 : vector<1x512xf32> to vector<8x512xf32>
    %16 = arith.addf %13, %15 : vector<8x512xf32>
    %cst_11 = arith.constant 0.000000e+00 : f32
    %17 = vector.broadcast %cst_11 : f32 to vector<8x512xf32>
    %18 = arith.maximumf %16, %17 : vector<8x512xf32>
    %c0_12 = arith.constant 0 : index
    %c0_13 = arith.constant 0 : index
    %19 = vector.load %arg6[%c0_12, %c0_13] : memref<256x512xbf16, #tpu.memory_space<vmem>>, vector<256x512xbf16>
    %cst_14 = arith.constant dense<0.000000e+00> : vector<8x512xf32>
    %20 = tpu.matmul %11, %19, %cst_14 {dimension_numbers = #tpu.dot_dimension_numbers<[1], [0], [0], [1], [0, 0, 1, 1], [], []>} : vector<8x256xbf16>, vector<256x512xbf16>, vector<8x512xf32> -> vector<8x512xf32>
    %c0_15 = arith.constant 0 : index
    %c0_16 = arith.constant 0 : index
    %21 = vector.load %arg7[%c0_15, %c0_16] : memref<1x512xf32, #tpu.memory_space<vmem>>, vector<1x512xf32>
    %22 = vector.broadcast %21 : vector<1x512xf32> to vector<8x512xf32>
    %23 = arith.addf %20, %22 : vector<8x512xf32>
    %cst_17 = arith.constant 0.000000e+00 : f32
    %24 = vector.broadcast %cst_17 : f32 to vector<8x512xf32>
    %25 = arith.maximumf %23, %24 : vector<8x512xf32>
    %c0_18 = arith.constant 0 : index
    %c0_19 = arith.constant 0 : index
    %26 = vector.load %arg8[%c0_18, %c0_19] : memref<1x512xf32, #tpu.memory_space<vmem>>, vector<1x512xf32>
    %27 = vector.broadcast %26 : vector<1x512xf32> to vector<8x512xf32>
    %28 = arith.mulf %18, %27 : vector<8x512xf32>
    %cst_20 = arith.constant dense<0.000000e+00> : vector<8xf32>
    %29 = vector.multi_reduction <add>, %28, %cst_20 [1] : vector<8x512xf32> to vector<8xf32>
    %30 = vector.shape_cast %29 : vector<8xf32> to vector<8x1xf32>
    %c0_21 = arith.constant 0 : index
    %c0_22 = arith.constant 0 : index
    %31 = vector.load %arg9[%c0_21, %c0_22] : memref<1x512xf32, #tpu.memory_space<vmem>>, vector<1x512xf32>
    %32 = vector.broadcast %31 : vector<1x512xf32> to vector<8x512xf32>
    %33 = arith.mulf %25, %32 : vector<8x512xf32>
    %cst_23 = arith.constant dense<0.000000e+00> : vector<8xf32>
    %34 = vector.multi_reduction <add>, %33, %cst_23 [1] : vector<8x512xf32> to vector<8xf32>
    %35 = vector.shape_cast %34 : vector<8xf32> to vector<8x1xf32>
    %36 = tpu.concatenate %30, %35 in 1 : vector<8x1xf32>, vector<8x1xf32> -> vector<8x2xf32>
    %c0_24 = arith.constant 0 : index
    %c0_25 = arith.constant 0 : index
    %37 = vector.load %arg10[%c0_24, %c0_25] : memref<1x2xf32, #tpu.memory_space<vmem>>, vector<1x2xf32>
    %38 = vector.broadcast %37 : vector<1x2xf32> to vector<8x2xf32>
    %39 = arith.addf %36, %38 : vector<8x2xf32>
    %c0_26 = arith.constant 0 : index
    %c0_27 = arith.constant 0 : index
    %40 = vector.load %arg11[%c0_26, %c0_27] : memref<8x2xf32, #tpu.memory_space<vmem>>, vector<8x2xf32>
    tpu.vector_store %arg11[%c0_26, %c0_27], %39 {strides = array<i32>} : memref<8x2xf32, #tpu.memory_space<vmem>>, vector<8x2xf32>,
    return
  }
  func.func @transform_0(%arg0: i32) -> (i32, i32) {
    %c0_i32 = arith.constant 0 : i32
    %c0_i32_0 = arith.constant 0 : i32
    return %arg0, %c0_i32 : i32, i32
  }
  func.func @transform_1(%arg0: i32) -> (i32, i32) {
    %c0_i32 = arith.constant 0 : i32
    %c0_i32_0 = arith.constant 0 : i32
    %c0_i32_1 = arith.constant 0 : i32
    return %c0_i32, %c0_i32_0 : i32, i32
  }
  func.func @transform_2(%arg0: i32) -> (i32, i32) {
    %c0_i32 = arith.constant 0 : i32
    %c0_i32_0 = arith.constant 0 : i32
    %c0_i32_1 = arith.constant 0 : i32
    return %c0_i32, %c0_i32_0 : i32, i32
  }
  func.func @transform_3(%arg0: i32) -> (i32, i32) {
    %c0_i32 = arith.constant 0 : i32
    %c0_i32_0 = arith.constant 0 : i32
    %c0_i32_1 = arith.constant 0 : i32
    return %c0_i32, %c0_i32_0 : i32, i32
  }
  func.func @transform_4(%arg0: i32) -> (i32, i32) {
    %c0_i32 = arith.constant 0 : i32
    %c0_i32_0 = arith.constant 0 : i32
    %c0_i32_1 = arith.constant 0 : i32
    return %c0_i32, %c0_i32_0 : i32, i32
  }
  func.func @transform_5(%arg0: i32) -> (i32, i32) {
    %c0_i32 = arith.constant 0 : i32
    %c0_i32_0 = arith.constant 0 : i32
    %c0_i32_1 = arith.constant 0 : i32
    return %c0_i32, %c0_i32_0 : i32, i32
  }
  func.func @transform_6(%arg0: i32) -> (i32, i32) {
    %c0_i32 = arith.constant 0 : i32
    %c0_i32_0 = arith.constant 0 : i32
    %c0_i32_1 = arith.constant 0 : i32
    return %c0_i32, %c0_i32_0 : i32, i32
  }
  func.func @transform_7(%arg0: i32) -> (i32, i32) {
    %c0_i32 = arith.constant 0 : i32
    %c0_i32_0 = arith.constant 0 : i32
    %c0_i32_1 = arith.constant 0 : i32
    return %c0_i32, %c0_i32_0 : i32, i32
  }
  func.func @transform_8(%arg0: i32) -> (i32, i32) {
    %c0_i32 = arith.constant 0 : i32
    %c0_i32_0 = arith.constant 0 : i32
    %c0_i32_1 = arith.constant 0 : i32
    return %c0_i32, %c0_i32_0 : i32, i32
  }
  func.func @transform_9(%arg0: i32) -> (i32, i32) {
    %c0_i32 = arith.constant 0 : i32
    %c0_i32_0 = arith.constant 0 : i32
    %c0_i32_1 = arith.constant 0 : i32
    return %c0_i32, %c0_i32_0 : i32, i32
  }
  func.func @transform_10(%arg0: i32) -> (i32, i32) {
    %c0_i32 = arith.constant 0 : i32
    %c0_i32_0 = arith.constant 0 : i32
    return %arg0, %c0_i32 : i32, i32
  }
}

</mosaic_0001>

<bundles_post_ra>
// kernel: critic_forward.1
= control target key start
LH: loop header
LB: loop body
LE: loop exit
PB: predicated region body
PF: predicated region fallthrough
CT: control target
= control target key end

     0   :  { %15 = vsyncpa [#allocation3], 0  ;;  %s1965_s0 = inlined_call_operand.vmem [shape: bf16[8,12], index: 0, kind: input, shape index: {}]   ;;  %s1966_s1 = inlined_call_operand.vmem [shape: bf16[12,512], index: 1, kind: input, shape index: {}]   ;;  %s1967_s2 = inlined_call_operand.vmem [shape: f32[1,512], index: 2, kind: input, shape index: {}]   ;;  %s1968_s3 = inlined_call_operand.hbm [shape: bf16[256,512], index: 3, kind: input, shape index: {}]   ;;  %s1969_s4 = inlined_call_operand.hbm [shape: f32[1,512], index: 4, kind: input, shape index: {}]   ;;  %s1970_s5 = inlined_call_operand.hbm [shape: bf16[256,512], index: 5, kind: input, shape index: {}]   ;;  %s1971_s6 = inlined_call_operand.hbm [shape: f32[1,512], index: 6, kind: input, shape index: {}]   ;;  %s1972_s7 = inlined_call_operand.vmem [shape: f32[1,512], index: 7, kind: input, shape index: {}]   ;;  %s1973_s8 = inlined_call_operand.vmem [shape: f32[1,512], index: 8, kind: input, shape index: {}]   ;;  %s1974_s9 = inlined_call_operand.hbm [shape: f32[1,2], index: 9, kind: input, shape index: {}]   ;;  %s1975_s10 = inlined_call_operand.vmem [shape: f32[8,2], index: 10, kind: output, shape index: {}]  }
   0x1   :  { %16 = vsyncpa [#allocation5], 0 }
   0x2   :  { %17 = vsyncpa [#allocation8], 0  ;;  %s1772_s13 = smov [#allocation4]   ;;  %s1773_s15 = smov [#allocation7]  }
   0x3   :  { %s42_s14 = sshll.u32 %s1772_s13, 4  ;;  %s64_s16 = sshll.u32 %s1773_s15, 4  ;;  %s43_s14 = int_to_ptr.vmem [resolvable:$true] %s42_s14  ;;  %s65_s16 = int_to_ptr.vmem [resolvable:$true] %s64_s16 }
   0x4   :  { %s1656_s19 = scalar_lea.hbm %s1969_s4, 64 }
   0x5   :  { %p1657_p0 = scmp.ne.s32.totalorder %s1969_s4, %s1656_s19  ;;  %p1660_p1 = scmp.lt.u32.totalorder %s1656_s19, %s1969_s4 }
   0x7   :  { %p1662_p2 = pnand %p1660_p1, %p1657_p0 }
   0x9   :  { %1665 = shalt.err (!%p1662_p2)
}
   0xa   :  { %s1666_s24 = scalar_lea.vmem %s43_s14, 64  ;;  %p1671_p4 = scmp.lt.s32.totalorder %s43_s14, %s43_s14 }
   0xb   :  { %p1667_p3 = scmp.ne.s32.totalorder %s43_s14, %s1666_s24  ;;  %p1672_p5 = scmp.lt.s32.totalorder %s1666_s24, %s1666_s24 }
   0xd   :  { %p1673_p6 = por %p1672_p5, %p1671_p4 }
   0xf   :  { %p1674_p7 = pnand %p1673_p6, %p1667_p3 }
  0x11   :  { %1677 = shalt.err (!%p1674_p7)
}
  0x12   :  { %45 = dma.hbm_to_vmem [thread:$0]  %s1969_s4, 64, %s43_s14, [#allocation5]  }
  0x13   :  { %s1678_s29 = scalar_lea.hbm %s1971_s6, 64 }
  0x14   :  { %p1679_p8 = scmp.ne.s32.totalorder %s1971_s6, %s1678_s29  ;;  %p1682_p9 = scmp.lt.u32.totalorder %s1678_s29, %s1971_s6 }
  0x16   :  { %p1684_p10 = pnand %p1682_p9, %p1679_p8 }
  0x18   :  { %1687 = shalt.err (!%p1684_p10)
}
  0x19   :  { %s1688_s15 = scalar_lea.vmem %s65_s16, 64  ;;  %p1693_p12 = scmp.lt.s32.totalorder %s65_s16, %s65_s16 }
  0x1a   :  { %p1689_p11 = scmp.ne.s32.totalorder %s65_s16, %s1688_s15  ;;  %p1694_p13 = scmp.lt.s32.totalorder %s1688_s15, %s1688_s15 }
  0x1c   :  { %p1695_p0 = por %p1694_p13, %p1693_p12 }
  0x1e   :  { %p1696_p1 = pnand %p1695_p0, %p1689_p11 }
  0x20   :  { %1699 = shalt.err (!%p1696_p1)
}
  0x21   :  { %67 = dma.hbm_to_vmem [thread:$0]  %s1971_s6, 64, %s65_s16, [#allocation8]  }
  0x22   :  { %s1774_s17 = smov [#allocation2]   ;;  %s1700_s21 = scalar_lea.hbm %s1968_s3, 8192 }
  0x23   :  { %s29_s18 = sshll.u32 %s1774_s17, 4  ;;  %p1701_p2 = scmp.ne.s32.totalorder %s1968_s3, %s1700_s21  ;;  %s30_s18 = int_to_ptr.vmem [resolvable:$true] %s29_s18 }
  0x24   :  { %p1704_p3 = scmp.lt.u32.totalorder %s1700_s21, %s1968_s3 }
  0x26   :  { %p1706_p4 = pnand %p1704_p3, %p1701_p2 }
  0x28   :  { %1709 = shalt.err (!%p1706_p4)
}
  0x29   :  { %s1710_s26 = scalar_lea.vmem %s30_s18, 8192  ;;  %p1715_p6 = scmp.lt.s32.totalorder %s30_s18, %s30_s18 }
  0x2a   :  { %p1711_p5 = scmp.ne.s32.totalorder %s30_s18, %s1710_s26  ;;  %p1716_p7 = scmp.lt.s32.totalorder %s1710_s26, %s1710_s26 }
  0x2c   :  { %p1717_p8 = por %p1716_p7, %p1715_p6 }
  0x2e   :  { %p1718_p9 = pnand %p1717_p8, %p1711_p5 }
  0x30   :  { %1721 = shalt.err (!%p1718_p9)
}
  0x31   :  { %s1775_s6 = smov 256   ;;  %s1776_s16 = smov 16  }
  0x32   :  { %35 = dma.hbm_to_vmem [thread:$0]  %s1968_s3, 8192, %s30_s18, [#allocation3], %s1775_s6, %s1775_s6, %s1776_s16  }
  0x33   :  { %s1777_s29 = smov [#allocation6]   ;;  %s1778_s11 = smov [#allocation9]  }
  0x34   :  { %s51_s30 = sshll.u32 %s1777_s29, 4  ;;  %s78_s12 = sshll.u32 %s1778_s11, 4  ;;  %s52_s30 = int_to_ptr.vmem [resolvable:$true] %s51_s30  ;;  %s79_s12 = int_to_ptr.vmem [resolvable:$true] %s78_s12 }
  0x35   :  { %s1722_s4 = scalar_lea.hbm %s1970_s5, 8192 }
  0x36   :  { %p1723_p10 = scmp.ne.s32.totalorder %s1970_s5, %s1722_s4  ;;  %p1726_p11 = scmp.lt.u32.totalorder %s1722_s4, %s1970_s5 }
  0x38   :  { %p1728_p12 = pnand %p1726_p11, %p1723_p10 }
  0x3a   :  { %1731 = shalt.err (!%p1728_p12)
}
  0x3b   :  { %s1732_s3 = scalar_lea.vmem %s52_s30, 8192  ;;  %p1737_p0 = scmp.lt.s32.totalorder %s52_s30, %s52_s30 }
  0x3c   :  { %p1733_p13 = scmp.ne.s32.totalorder %s52_s30, %s1732_s3  ;;  %p1738_p1 = scmp.lt.s32.totalorder %s1732_s3, %s1732_s3 }
  0x3e   :  { %p1739_p2 = por %p1738_p1, %p1737_p0 }
  0x40   :  { %p1740_p3 = pnand %p1739_p2, %p1733_p13 }
  0x42   :  { %1743 = shalt.err (!%p1740_p3)
}
  0x43   :  { %57 = dma.hbm_to_vmem [thread:$0]  %s1970_s5, 8192, %s52_s30, [#allocation5], %s1775_s6, %s1775_s6, %s1776_s16  }
  0x44   :  { %s1744_s24 = scalar_lea.hbm %s1974_s9, 16 }
  0x45   :  { %p1745_p4 = scmp.ne.s32.totalorder %s1974_s9, %s1744_s24  ;;  %p1748_p5 = scmp.lt.u32.totalorder %s1744_s24, %s1974_s9 }
  0x47   :  { %p1750_p6 = pnand %p1748_p5, %p1745_p4 }
  0x49   :  { %1753 = shalt.err (!%p1750_p6)
}
  0x4a   :  { %s1754_s29 = scalar_lea.vmem %s79_s12, 16  ;;  %s1758_s11 = scalar_lea.vmem %s79_s12, 32 }
  0x4b   :  { %p1755_p7 = scmp.ne.s32.totalorder %s79_s12, %s1754_s29  ;;  %p1759_p8 = scmp.lt.s32.totalorder %s79_s12, %s79_s12 }
  0x4c   :  { %p1760_p9 = scmp.lt.s32.totalorder %s1758_s11, %s1754_s29 }
  0x4e   :  { %p1761_p10 = por %p1760_p9, %p1759_p8 }
  0x50   :  { %p1762_p11 = pnand %p1761_p10, %p1755_p7 }
  0x52   :  { %1765 = shalt.err (!%p1762_p11)
}
  0x53   :  { %81 = dma.hbm_to_vmem [thread:$0]  %s1974_s9, 16, %s79_s12, [#allocation8]  }
  0x54   :  { %1766 = dma.done.wait [#allocation3], 8192  }
  0x55   :  { %1767 = vsyncadd [#allocation3], 4294959104 }
  0x56   :  { %1768 = dma.done.wait [#allocation5], 8256  }
  0x57   :  { %1769 = vsyncadd [#allocation5], 4294959040 }
  0x58   :  { %1770 = dma.done.wait [#allocation8], 80  }
  0x59   :  { %1771 = vsyncadd [#allocation8], 4294967216  ;;  %v1779_v0 = vmov 0   ;;  %vm145_vm0 = vcmask 1045504   ;;  %v98_v3 = vld [vmem:[%s1965_s0] sm:$0xf] }
  0x5a   :  { %190 = vmatprep.mubr.bf16.mxu0 %v1779_v0  ;;  %231 = vmatprep.mubr.bf16.mxu1 %v1779_v0  ;;  %v1458_v1 = vld [vmem:[%s1966_s1 + $0x4] ss:$16 sps:$4 sm:$0x3f]   ;;  %v1460_v2 = vld [vmem:[%s1966_s1] ss:$16 sps:$4 sm:$0x3f]  }
  0x5b   :  { %1317 = vmatprep.subr.msk.bf16.mxu0 %vm145_vm0, %v1458_v1  ;;  %v1461_v4 = vld [vmem:[%s1966_s1 + $0xc] ss:$16 sps:$4 sm:$0x3f]   ;;  %v147_v5 = vsel %vm145_vm0, %v1460_v2, 0  ;;  %vm141_vm1 = vcmask 97280   ;;  %vm1294_vm2 = vcmask 7168  }
  0x5c   :  { %v1463_v6 = vld [vmem:[%s1966_s1 + $0x8] ss:$16 sps:$4 sm:$0x3f]   ;;  %159 = vmatpush1.bf16.msra.mxu0 %v147_v5  ;;  %1319 = vmatprep.subr.msk.bf16.mxu1 %vm145_vm0, %v1461_v4  ;;  %v1464_v7 = vld [vmem:[#allocation2] ss:$16 sps:$4 sm:$0xff]   ;;  %vm1304_vm3 = vcmask 15360  }
  0x5d   :  { %v1466_v8 = vld [vmem:[#allocation2 + $0x4] ss:$16 sps:$4 sm:$0xff]   ;;  %v153_v9 = vsel %vm145_vm0, %v1463_v6, 0  ;;  %v1469_v10 = vld [vmem:[#allocation2 + $0xc] ss:$16 sps:$4 sm:$0xff]  }
  0x5e   :  { %200 = vmatpush1.bf16.msra.mxu1 %v153_v9  ;;  %654 = vmatprep.subr.bf16.mxu0 %v1466_v8  ;;  %v1467_v11 = vld [vmem:[#allocation2 + $0x8] ss:$16 sps:$4 sm:$0xff]   ;;  %v1472_v12 = vld [vmem:[#allocation2 + $0x24] ss:$16 sps:$4 sm:$0xff]   ;;  %v1470_v13 = vld [vmem:[#allocation2 + $0x20] ss:$16 sps:$4 sm:$0xff]  }
  0x5f   :  { %1318 = vmatmul.mubr.msk.bf16.vlgmr.msra.gmra.mrb[0].mxu0 %vm141_vm1, %v98_v3  ;;  %695 = vmatprep.subr.bf16.mxu1 %v1469_v10  ;;  %v1475_v14 = vld [vmem:[#allocation2 + $0x2c] ss:$16 sps:$4 sm:$0xff]   ;;  %v1478_v15 = vld [vmem:[#allocation2 + $0x44] ss:$16 sps:$4 sm:$0xff]   ;;  %v1473_v16 = vld [vmem:[#allocation2 + $0x28] ss:$16 sps:$4 sm:$0xff]   ;;  %v105_v10 = vlaneseq }
  0x60   :  { %655 = vmatpush1.bf16.msra.mxu0 %v1464_v7  ;;  %v1481_v17 = vld [vmem:[#allocation2 + $0x4c] ss:$16 sps:$4 sm:$0xff]   ;;  %v1476_v18 = vld [vmem:[#allocation2 + $0x40] ss:$16 sps:$4 sm:$0xff]   ;;  %v1484_v19 = vld [vmem:[#allocation2 + $0x64] ss:$16 sps:$4 sm:$0xff]  }
  0x61   :  { %1320 = vmatmul.mubr.msk.bf16.vlgmr.msra.gmra.mrb[0].mxu1 %vm141_vm1, %v98_v3  ;;  %656 = vmatprep.subr.bf16.mxu0 %v1472_v12  ;;  %v1479_v20 = vld [vmem:[#allocation2 + $0x48] ss:$16 sps:$4 sm:$0xff]   ;;  %v1487_v21 = vld [vmem:[#allocation2 + $0x6c] ss:$16 sps:$4 sm:$0xff]   ;;  %v1482_v22 = vld [vmem:[#allocation2 + $0x60] ss:$16 sps:$4 sm:$0xff]  }
  0x62   :  { %696 = vmatpush1.bf16.msra.mxu1 %v1467_v11  ;;  %v1490_v23 = vld [vmem:[#allocation2 + $0x84] ss:$16 sps:$4 sm:$0xff]   ;;  %v1485_v24 = vld [vmem:[#allocation2 + $0x68] ss:$16 sps:$4 sm:$0xff]   ;;  %v1493_v25 = vld [vmem:[#allocation2 + $0x8c] ss:$16 sps:$4 sm:$0xff]  }
  0x63   :  { %697 = vmatprep.subr.bf16.mxu1 %v1475_v14  ;;  %v1488_v26 = vld [vmem:[#allocation2 + $0x80] ss:$16 sps:$4 sm:$0xff]   ;;  %v1496_v27 = vld [vmem:[#allocation2 + $0xa4] ss:$16 sps:$4 sm:$0xff]   ;;  %v1491_v28 = vld [vmem:[#allocation2 + $0x88] ss:$16 sps:$4 sm:$0xff]  }
  0x64   :  { %657 = vmatpush1.bf16.msra.mxu0 %v1470_v13  ;;  %v1499_v29 = vld [vmem:[#allocation2 + $0xac] ss:$16 sps:$4 sm:$0xff]   ;;  %v1494_v30 = vld [vmem:[#allocation2 + $0xa0] ss:$16 sps:$4 sm:$0xff]   ;;  %v1502_v31 = vld [vmem:[#allocation2 + $0xc4] ss:$16 sps:$4 sm:$0xff]  }
  0x65   :  { %658 = vmatprep.subr.bf16.mxu0 %v1478_v15  ;;  %v1497_v32 = vld [vmem:[#allocation2 + $0xa8] ss:$16 sps:$4 sm:$0xff]   ;;  %v1505_v33 = vld [vmem:[#allocation2 + $0xcc] ss:$16 sps:$4 sm:$0xff]   ;;  %v1500_v34 = vld [vmem:[#allocation2 + $0xc0] ss:$16 sps:$4 sm:$0xff]  }
  0x66   :  { %698 = vmatpush1.bf16.msra.mxu1 %v1473_v16  ;;  %v1508_v35 = vld [vmem:[#allocation2 + $0xe4] ss:$16 sps:$4 sm:$0xff]   ;;  %v1503_v36 = vld [vmem:[#allocation2 + $0xc8] ss:$16 sps:$4 sm:$0xff]   ;;  %v1511_v37 = vld [vmem:[#allocation2 + $0xec] ss:$16 sps:$4 sm:$0xff]  }
  0x67   :  { %699 = vmatprep.subr.bf16.mxu1 %v1481_v17  ;;  %v1506_v38 = vld [vmem:[#allocation2 + $0xe0] ss:$16 sps:$4 sm:$0xff]   ;;  %v1514_v39 = vld [vmem:[#allocation2 + $0x104] ss:$16 sps:$4 sm:$0xff]   ;;  %v1509_v40 = vld [vmem:[#allocation2 + $0xe8] ss:$16 sps:$4 sm:$0xff]  }
  0x68   :  { %659 = vmatpush1.bf16.msra.mxu0 %v1476_v18  ;;  %v1517_v41 = vld [vmem:[#allocation2 + $0x10c] ss:$16 sps:$4 sm:$0xff]   ;;  %v1512_v42 = vld [vmem:[#allocation2 + $0x100] ss:$16 sps:$4 sm:$0xff]   ;;  %v1520_v43 = vld [vmem:[#allocation2 + $0x124] ss:$16 sps:$4 sm:$0xff]  }
  0x69   :  { %660 = vmatprep.subr.bf16.mxu0 %v1484_v19  ;;  %v1515_v44 = vld [vmem:[#allocation2 + $0x108] ss:$16 sps:$4 sm:$0xff]   ;;  %v1518_v45 = vld [vmem:[#allocation2 + $0x120] ss:$16 sps:$4 sm:$0xff]   ;;  %v1523_v46 = vld [vmem:[#allocation2 + $0x12c] ss:$16 sps:$4 sm:$0xff]  }
  0x6a   :  { %700 = vmatpush1.bf16.msra.mxu1 %v1479_v20  ;;  %v1521_v47 = vld [vmem:[#allocation2 + $0x128] ss:$16 sps:$4 sm:$0xff]   ;;  %v1526_v48 = vld [vmem:[#allocation2 + $0x144] ss:$16 sps:$4 sm:$0xff]   ;;  %v1529_v49 = vld [vmem:[#allocation2 + $0x14c] ss:$16 sps:$4 sm:$0xff]  }
  0x6b   :  { %701 = vmatprep.subr.bf16.mxu1 %v1487_v21  ;;  %v1524_v50 = vld [vmem:[#allocation2 + $0x140] ss:$16 sps:$4 sm:$0xff]   ;;  %v1532_v51 = vld [vmem:[#allocation2 + $0x164] ss:$16 sps:$4 sm:$0xff]   ;;  %v1527_v52 = vld [vmem:[#allocation2 + $0x148] ss:$16 sps:$4 sm:$0xff]  }
  0x6c   :  { %661 = vmatpush1.bf16.msra.mxu0 %v1482_v22  ;;  %v1535_v53 = vld [vmem:[#allocation2 + $0x16c] ss:$16 sps:$4 sm:$0xff]   ;;  %v1530_v54 = vld [vmem:[#allocation2 + $0x160] ss:$16 sps:$4 sm:$0xff]   ;;  %v1538_v55 = vld [vmem:[#allocation2 + $0x184] ss:$16 sps:$4 sm:$0xff]  }
  0x6d   :  { %662 = vmatprep.subr.bf16.mxu0 %v1490_v23  ;;  %v1533_v56 = vld [vmem:[#allocation2 + $0x168] ss:$16 sps:$4 sm:$0xff]   ;;  %v1541_v57 = vld [vmem:[#allocation2 + $0x18c] ss:$16 sps:$4 sm:$0xff]   ;;  %v1536_v58 = vld [vmem:[#allocation2 + $0x180] ss:$16 sps:$4 sm:$0xff]  }
  0x6e   :  { %702 = vmatpush1.bf16.msra.mxu1 %v1485_v24  ;;  %v1544_v59 = vld [vmem:[#allocation2 + $0x1a4] ss:$16 sps:$4 sm:$0xff]   ;;  %v1539_v60 = vld [vmem:[#allocation2 + $0x188] ss:$16 sps:$4 sm:$0xff]   ;;  %v1547_v61 = vld [vmem:[#allocation2 + $0x1ac] ss:$16 sps:$4 sm:$0xff]  }
  0x6f   :  { %703 = vmatprep.subr.bf16.mxu1 %v1493_v25  ;;  %v1542_v62 = vld [vmem:[#allocation2 + $0x1a0] ss:$16 sps:$4 sm:$0xff]   ;;  %v1545_v63 = vld [vmem:[#allocation2 + $0x1a8] ss:$16 sps:$4 sm:$0xff]   ;;  %v1550_v0 = vld [vmem:[#allocation2 + $0x1c4] ss:$16 sps:$4 sm:$0xff]  }
  0x70   :  { %663 = vmatpush1.bf16.msra.mxu0 %v1488_v26  ;;  %v1553_v1 = vld [vmem:[#allocation2 + $0x1cc] ss:$16 sps:$4 sm:$0xff]   ;;  %v1548_v2 = vld [vmem:[#allocation2 + $0x1c0] ss:$16 sps:$4 sm:$0xff]   ;;  %v1551_v3 = vld [vmem:[#allocation2 + $0x1c8] ss:$16 sps:$4 sm:$0xff]  }
  0x71   :  { %664 = vmatprep.subr.bf16.mxu0 %v1496_v27  ;;  %v1556_v4 = vld [vmem:[#allocation2 + $0x1e4] ss:$16 sps:$4 sm:$0xff]   ;;  %v1559_v5 = vld [vmem:[#allocation2 + $0x1ec] ss:$16 sps:$4 sm:$0xff]   ;;  %v1554_v6 = vld [vmem:[#allocation2 + $0x1e0] ss:$16 sps:$4 sm:$0xff]  }
  0x72   :  { %704 = vmatpush1.bf16.msra.mxu1 %v1491_v28  ;;  %v1557_v7 = vld [vmem:[#allocation2 + $0x1e8] ss:$16 sps:$4 sm:$0xff]   ;;  %v1565_v9 = vld [vmem:[#allocation6 + $0xc] ss:$16 sps:$4 sm:$0xff]   ;;  %v1910_v11 = vshrl.u32 %v105_v10, 7 }
  0x73   :  { %705 = vmatprep.subr.bf16.mxu1 %v1499_v29  ;;  %v1562_v8 = vld [vmem:[#allocation6 + $0x4] ss:$16 sps:$4 sm:$0xff]   ;;  %v1918_v13 = vld [vmem:[%s1967_s2] sm:$0xf] }
  0x74   :  { %665 = vmatpush1.bf16.msra.mxu0 %v1494_v30  ;;  %v1913_v12 = vsub.s32 0, %v1910_v11  ;;  %v1921_v14 = vsub.s32 1, %v1910_v11  ;;  %v1924_v15 = vsub.s32 3, %v1910_v11  ;;  %v1622_v10 = vld [vmem:[#allocation6 + $0x144] ss:$16 sps:$4 sm:$0xff]  }
  0x75   :  { %666 = vmatprep.subr.bf16.mxu0 %v1502_v31 }
  0x76   :  { %706 = vmatpush1.bf16.msra.mxu1 %v1497_v32  ;;  %v108_v16 = vrot.slane %v1918_v13, %v1913_v12  ;;  %v112_v17 = vrot.slane %v1918_v13, %v1921_v14  ;;  %v120_v19 = vrot.slane %v1918_v13, %v1924_v15 }
  0x77   :  { %707 = vmatprep.subr.bf16.mxu1 %v1505_v33  ;;  %v1560_v33 = vld [vmem:[#allocation6] ss:$16 sps:$4 sm:$0xff]  }
  0x78   :  { %667 = vmatpush1.bf16.msra.mxu0 %v1500_v34  ;;  %v1563_v34 = vld [vmem:[#allocation6 + $0x8] ss:$16 sps:$4 sm:$0xff]  }
  0x79   :  { %668 = vmatprep.subr.bf16.mxu0 %v1508_v35 }
  0x7a   :  { %708 = vmatpush1.bf16.msra.mxu1 %v1503_v36 }
  0x7b   :  { %709 = vmatprep.subr.bf16.mxu1 %v1511_v37  ;;  %v1568_v37 = vld [vmem:[#allocation6 + $0x24] ss:$16 sps:$4 sm:$0xff]  }
  0x7c   :  { %669 = vmatpush1.bf16.msra.mxu0 %v1506_v38  ;;  %v1571_v38 = vld [vmem:[#allocation6 + $0x2c] ss:$16 sps:$4 sm:$0xff]  }
  0x7d   :  { %670 = vmatprep.subr.bf16.mxu0 %v1514_v39 }
  0x7e   :  { %710 = vmatpush1.bf16.msra.mxu1 %v1509_v40  ;;  %v1566_v40 = vld [vmem:[#allocation6 + $0x20] ss:$16 sps:$4 sm:$0xff]  }
  0x7f   :  { %711 = vmatprep.subr.bf16.mxu1 %v1517_v41  ;;  %v1569_v41 = vld [vmem:[#allocation6 + $0x28] ss:$16 sps:$4 sm:$0xff]  }
  0x80   :  { %671 = vmatpush1.bf16.msra.mxu0 %v1512_v42  ;;  %v1574_v42 = vld [vmem:[#allocation6 + $0x44] ss:$16 sps:$4 sm:$0xff]  }
  0x81   :  { %672 = vmatprep.subr.bf16.mxu0 %v1520_v43  ;;  %v1577_v43 = vld [vmem:[#allocation6 + $0x4c] ss:$16 sps:$4 sm:$0xff]  }
  0x82   :  { %712 = vmatpush1.bf16.msra.mxu1 %v1515_v44  ;;  %v1572_v44 = vld [vmem:[#allocation6 + $0x40] ss:$16 sps:$4 sm:$0xff]  }
  0x83   :  { %713 = vmatprep.subr.bf16.mxu1 %v1523_v46  ;;  %v1580_v46 = vld [vmem:[#allocation6 + $0x64] ss:$16 sps:$4 sm:$0xff]  }
  0x84   :  { %673 = vmatpush1.bf16.msra.mxu0 %v1518_v45  ;;  %v1575_v45 = vld [vmem:[#allocation6 + $0x48] ss:$16 sps:$4 sm:$0xff]  }
  0x85   :  { %674 = vmatprep.subr.bf16.mxu0 %v1526_v48  ;;  %v1578_v48 = vld [vmem:[#allocation6 + $0x60] ss:$16 sps:$4 sm:$0xff]  }
  0x86   :  { %714 = vmatpush1.bf16.msra.mxu1 %v1521_v47  ;;  %v1583_v47 = vld [vmem:[#allocation6 + $0x6c] ss:$16 sps:$4 sm:$0xff]  }
  0x87   :  { %715 = vmatprep.subr.bf16.mxu1 %v1529_v49  ;;  %v1581_v49 = vld [vmem:[#allocation6 + $0x68] ss:$16 sps:$4 sm:$0xff]  }
  0x88   :  { %675 = vmatpush1.bf16.msra.mxu0 %v1524_v50  ;;  %v1586_v50 = vld [vmem:[#allocation6 + $0x84] ss:$16 sps:$4 sm:$0xff]  }
  0x89   :  { %676 = vmatprep.subr.bf16.mxu0 %v1532_v51  ;;  %v1589_v51 = vld [vmem:[#allocation6 + $0x8c] ss:$16 sps:$4 sm:$0xff]  }
  0x8a   :  { %716 = vmatpush1.bf16.msra.mxu1 %v1527_v52  ;;  %v1584_v52 = vld [vmem:[#allocation6 + $0x80] ss:$16 sps:$4 sm:$0xff]  }
  0x8b   :  { %717 = vmatprep.subr.bf16.mxu1 %v1535_v53  ;;  %v1587_v53 = vld [vmem:[#allocation6 + $0x88] ss:$16 sps:$4 sm:$0xff]  }
  0x8c   :  { %677 = vmatpush1.bf16.msra.mxu0 %v1530_v54  ;;  %v1592_v54 = vld [vmem:[#allocation6 + $0xa4] ss:$16 sps:$4 sm:$0xff]  }
  0x8d   :  { %678 = vmatprep.subr.bf16.mxu0 %v1538_v55  ;;  %v1595_v55 = vld [vmem:[#allocation6 + $0xac] ss:$16 sps:$4 sm:$0xff]  }
  0x8e   :  { %718 = vmatpush1.bf16.msra.mxu1 %v1533_v56  ;;  %v1590_v56 = vld [vmem:[#allocation6 + $0xa0] ss:$16 sps:$4 sm:$0xff]  }
  0x8f   :  { %719 = vmatprep.subr.bf16.mxu1 %v1541_v57  ;;  %v1593_v57 = vld [vmem:[#allocation6 + $0xa8] ss:$16 sps:$4 sm:$0xff]  }
  0x90   :  { %679 = vmatpush1.bf16.msra.mxu0 %v1536_v58  ;;  %v1598_v58 = vld [vmem:[#allocation6 + $0xc4] ss:$16 sps:$4 sm:$0xff]  }
  0x91   :  { %680 = vmatprep.subr.bf16.mxu0 %v1544_v59  ;;  %v1601_v59 = vld [vmem:[#allocation6 + $0xcc] ss:$16 sps:$4 sm:$0xff]  }
  0x92   :  { %720 = vmatpush1.bf16.msra.mxu1 %v1539_v60  ;;  %v1596_v60 = vld [vmem:[#allocation6 + $0xc0] ss:$16 sps:$4 sm:$0xff]  }
  0x93   :  { %721 = vmatprep.subr.bf16.mxu1 %v1547_v61  ;;  %v1599_v61 = vld [vmem:[#allocation6 + $0xc8] ss:$16 sps:$4 sm:$0xff]  }
  0x94   :  { %681 = vmatpush1.bf16.msra.mxu0 %v1542_v62  ;;  %v1604_v62 = vld [vmem:[#allocation6 + $0xe4] ss:$16 sps:$4 sm:$0xff]  }
  0x95   :  { %682 = vmatprep.subr.bf16.mxu0 %v1550_v0  ;;  %v1602_v0 = vld [vmem:[#allocation6 + $0xe0] ss:$16 sps:$4 sm:$0xff]  }
  0x96   :  { %722 = vmatpush1.bf16.msra.mxu1 %v1545_v63  ;;  %v1607_v63 = vld [vmem:[#allocation6 + $0xec] ss:$16 sps:$4 sm:$0xff]  }
  0x97   :  { %723 = vmatprep.subr.bf16.mxu1 %v1553_v1  ;;  %v1605_v1 = vld [vmem:[#allocation6 + $0xe8] ss:$16 sps:$4 sm:$0xff]  }
  0x98   :  { %683 = vmatpush1.bf16.msra.mxu0 %v1548_v2  ;;  %v1610_v2 = vld [vmem:[#allocation6 + $0x104] ss:$16 sps:$4 sm:$0xff]  }
  0x99   :  { %684 = vmatprep.subr.bf16.mxu0 %v1556_v4  ;;  %v1608_v4 = vld [vmem:[#allocation6 + $0x100] ss:$16 sps:$4 sm:$0xff]  }
  0x9a   :  { %724 = vmatpush1.bf16.msra.mxu1 %v1551_v3  ;;  %v1613_v3 = vld [vmem:[#allocation6 + $0x10c] ss:$16 sps:$4 sm:$0xff]  }
  0x9b   :  { %725 = vmatprep.subr.bf16.mxu1 %v1559_v5  ;;  %v1611_v5 = vld [vmem:[#allocation6 + $0x108] ss:$16 sps:$4 sm:$0xff]  }
  0x9c   :  { %685 = vmatpush1.bf16.msra.mxu0 %v1554_v6  ;;  %v1616_v6 = vld [vmem:[#allocation6 + $0x124] ss:$16 sps:$4 sm:$0xff]  }
  0x9d   :  { %1146 = vmatprep.subr.bf16.mxu0 %v1562_v8  ;;  %v1614_v8 = vld [vmem:[#allocation6 + $0x120] ss:$16 sps:$4 sm:$0xff]  }
  0x9e   :  { %726 = vmatpush1.bf16.msra.mxu1 %v1557_v7  ;;  %v1619_v7 = vld [vmem:[#allocation6 + $0x12c] ss:$16 sps:$4 sm:$0xff]  }
  0x9f   :  { %1187 = vmatprep.subr.bf16.mxu1 %v1565_v9  ;;  %v1617_v9 = vld [vmem:[#allocation6 + $0x128] ss:$16 sps:$4 sm:$0xff]  }
 0x132   :  { %v192_v18 = vpop.f32.mrb[0].mxu0 }
 0x133   :  { %v193_v20 = vadd.f32 %v192_v18, %v108_v16  ;;  %v194_v21 = vpop.f32.mrb[1].mxu0  ;;  %v1625_v16 = vld [vmem:[#allocation6 + $0x14c] ss:$16 sps:$4 sm:$0xff]   ;;  %v1623_v18 = vld [vmem:[#allocation6 + $0x148] ss:$16 sps:$4 sm:$0xff]  }
 0x134   :  { %v195_v22 = vadd.f32 %v194_v21, %v112_v17  ;;  %v196_v23 = vpop.f32.mrb[2].mxu0  ;;  %v1932_v24 = vpop.f32.mrb[0].mxu1  ;;  %v1620_v17 = vld [vmem:[#allocation6 + $0x140] ss:$16 sps:$4 sm:$0xff]  }
 0x135   :  { %v240_v25 = vmax.f32 %v193_v20, 0.0  ;;  %v197_v26 = vpop.f32.mrb[3].mxu0  ;;  %v235_v27 = vpop.f32.mrb[1].mxu1  ;;  %v1631_v20 = vld [vmem:[#allocation6 + $0x16c] ss:$16 sps:$4 sm:$0xff]  }
 0x136   :  { %v241_v28 = vmax.f32 %v195_v22, 0.0  ;;  %v236_v29 = vadd.f32 %v235_v27, %v120_v19  ;;  %v237_v30 = vpop.f32.mrb[2].mxu1  ;;  %v1628_v19 = vld [vmem:[#allocation6 + $0x164] ss:$16 sps:$4 sm:$0xff]   ;;  %v1626_v21 = vld [vmem:[#allocation6 + $0x160] ss:$16 sps:$4 sm:$0xff]  }
 0x137   :  { %v238_v31 = vpop.f32.mrb[3].mxu1  ;;  %v244_v36 = vpack.c.bf16 %v240_v25, %v240_v25  ;;  %v1629_v22 = vld [vmem:[#allocation6 + $0x168] ss:$16 sps:$4 sm:$0xff]   ;;  %v1634_v23 = vld [vmem:[#allocation6 + $0x184] ss:$16 sps:$4 sm:$0xff]  }
 0x138   :  { %v245_v32 = vpack.c.bf16 %v241_v28, %v241_v28  ;;  %v243_v35 = vmax.f32 %v236_v29, 0.0  ;;  %v1637_v25 = vld [vmem:[#allocation6 + $0x18c] ss:$16 sps:$4 sm:$0xff]   ;;  %v1632_v26 = vld [vmem:[#allocation6 + $0x180] ss:$16 sps:$4 sm:$0xff]   ;;  %v1935_v28 = vsub.s32 2, %v1910_v11 }
 0x139   :  { %v1635_v27 = vld [vmem:[#allocation6 + $0x188] ss:$16 sps:$4 sm:$0xff]   ;;  %v1640_v29 = vld [vmem:[#allocation6 + $0x1a4] ss:$16 sps:$4 sm:$0xff]   ;;  %v1643_v30 = vld [vmem:[#allocation6 + $0x1ac] ss:$16 sps:$4 sm:$0xff]  }
 0x13a   :  { %686 = vmatprep.mubr.bf16.mxu0 %v245_v32  ;;  %727 = vmatprep.mubr.bf16.mxu1 %v245_v32  ;;  %v247_v39 = vpack.c.bf16 %v243_v35, %v243_v35  ;;  %v1638_v31 = vld [vmem:[#allocation6 + $0x1a0] ss:$16 sps:$4 sm:$0xff]   ;;  %v1641_v32 = vld [vmem:[#allocation6 + $0x1a8] ss:$16 sps:$4 sm:$0xff]   ;;  %v1649_v35 = vld [vmem:[#allocation6 + $0x1cc] ss:$16 sps:$4 sm:$0xff]  }
 0x13b   :  { %687 = vmatmul.mubr.bf16.vlgmr.msra.gmra.mrb[4].mxu0 %v244_v36  ;;  %728 = vmatmul.mubr.bf16.vlgmr.msra.gmra.mrb[4].mxu1 %v244_v36  ;;  %v1644_v36 = vld [vmem:[#allocation6 + $0x1c0] ss:$16 sps:$4 sm:$0xff]  }
 0x13c   :  { %1147 = vmatpush1.bf16.msra.mxu0 %v1560_v33  ;;  %1188 = vmatpush1.bf16.msra.mxu1 %v1563_v34  ;;  %v116_v33 = vrot.slane %v1918_v13, %v1935_v28  ;;  %v1646_v34 = vld [vmem:[#allocation6 + $0x1c4] ss:$16 sps:$4 sm:$0xff]  }
 0x13d   :  { %1148 = vmatprep.subr.bf16.mxu0 %v1568_v37  ;;  %1189 = vmatprep.subr.bf16.mxu1 %v1571_v38  ;;  %v1647_v37 = vld [vmem:[#allocation6 + $0x1c8] ss:$16 sps:$4 sm:$0xff]   ;;  %v1652_v38 = vld [vmem:[#allocation6 + $0x1e4] ss:$16 sps:$4 sm:$0xff]  }
 0x13e   :  { %1178 = vmatprep.mubr.bf16.mxu0 %v247_v39  ;;  %1219 = vmatprep.mubr.bf16.mxu1 %v247_v39  ;;  %v234_v11 = vadd.f32 %v1932_v24, %v116_v33  ;;  %v1655_v39 = vld [vmem:[#allocation6 + $0x1ec] ss:$16 sps:$4 sm:$0xff]  }
 0x140   :  { %1149 = vmatpush1.bf16.msra.mxu0 %v1566_v40  ;;  %1190 = vmatpush1.bf16.msra.mxu1 %v1569_v41  ;;  %v1650_v40 = vld [vmem:[#allocation6 + $0x1e0] ss:$16 sps:$4 sm:$0xff]   ;;  %v1653_v41 = vld [vmem:[#allocation6 + $0x1e8] ss:$16 sps:$4 sm:$0xff]  }
 0x141   :  { %1150 = vmatprep.subr.bf16.mxu0 %v1574_v42  ;;  %1191 = vmatprep.subr.bf16.mxu1 %v1577_v43  ;;  %v242_v42 = vmax.f32 %v234_v11, 0.0  ;;  %v312_v43 = vld [vmem:[#allocation4] sm:$0xf] }
 0x142   :  { %v325_v24 = vrot.slane %v312_v43, %v1935_v28 }
 0x143   :  { %v246_v13 = vpack.c.bf16 %v242_v42, %v242_v42 }
 0x144   :  { %1151 = vmatpush1.bf16.msra.mxu0 %v1572_v44  ;;  %1192 = vmatpush1.bf16.msra.mxu1 %v1575_v45  ;;  %v317_v44 = vrot.slane %v312_v43, %v1913_v12  ;;  %v1232_v45 = vld [vmem:[%s1972_s7] sm:$0xf] }
 0x145   :  { %1152 = vmatprep.subr.bf16.mxu0 %v1580_v46  ;;  %1193 = vmatprep.subr.bf16.mxu1 %v1583_v47  ;;  %v321_v46 = vrot.slane %v312_v43, %v1921_v14  ;;  %v329_v47 = vrot.slane %v312_v43, %v1924_v15 }
 0x148   :  { %1153 = vmatpush1.bf16.msra.mxu0 %v1578_v48  ;;  %1194 = vmatpush1.bf16.msra.mxu1 %v1581_v49 }
 0x149   :  { %1154 = vmatprep.subr.bf16.mxu0 %v1586_v50  ;;  %1195 = vmatprep.subr.bf16.mxu1 %v1589_v51  ;;  %v1237_v51 = vrot.slane %v1232_v45, %v1913_v12 }
 0x14c   :  { %1155 = vmatpush1.bf16.msra.mxu0 %v1584_v52  ;;  %1196 = vmatpush1.bf16.msra.mxu1 %v1587_v53 }
 0x14d   :  { %1156 = vmatprep.subr.bf16.mxu0 %v1592_v54  ;;  %1197 = vmatprep.subr.bf16.mxu1 %v1595_v55 }
 0x150   :  { %1157 = vmatpush1.bf16.msra.mxu0 %v1590_v56  ;;  %1198 = vmatpush1.bf16.msra.mxu1 %v1593_v57  ;;  %v1241_v56 = vrot.slane %v1232_v45, %v1921_v14 }
 0x151   :  { %1158 = vmatprep.subr.bf16.mxu0 %v1598_v58  ;;  %1199 = vmatprep.subr.bf16.mxu1 %v1601_v59 }
 0x154   :  { %1159 = vmatpush1.bf16.msra.mxu0 %v1596_v60  ;;  %1200 = vmatpush1.bf16.msra.mxu1 %v1599_v61 }
 0x155   :  { %1160 = vmatprep.subr.bf16.mxu0 %v1604_v62  ;;  %1201 = vmatprep.subr.bf16.mxu1 %v1607_v63 }
 0x158   :  { %1161 = vmatpush1.bf16.msra.mxu0 %v1602_v0  ;;  %1202 = vmatpush1.bf16.msra.mxu1 %v1605_v1  ;;  %v1245_v0 = vrot.slane %v1232_v45, %v1935_v28 }
 0x159   :  { %1162 = vmatprep.subr.bf16.mxu0 %v1610_v2  ;;  %1203 = vmatprep.subr.bf16.mxu1 %v1613_v3 }
 0x15c   :  { %1163 = vmatpush1.bf16.msra.mxu0 %v1608_v4  ;;  %1204 = vmatpush1.bf16.msra.mxu1 %v1611_v5  ;;  %v1249_v5 = vrot.slane %v1232_v45, %v1924_v15 }
 0x15d   :  { %1164 = vmatprep.subr.bf16.mxu0 %v1616_v6  ;;  %1205 = vmatprep.subr.bf16.mxu1 %v1619_v7 }
 0x160   :  { %1165 = vmatpush1.bf16.msra.mxu0 %v1614_v8  ;;  %1206 = vmatpush1.bf16.msra.mxu1 %v1617_v9 }
 0x161   :  { %1166 = vmatprep.subr.bf16.mxu0 %v1622_v10  ;;  %1207 = vmatprep.subr.bf16.mxu1 %v1625_v16  ;;  %v804_v16 = vld [vmem:[#allocation7] sm:$0xf] }
 0x164   :  { %1167 = vmatpush1.bf16.msra.mxu0 %v1620_v17  ;;  %1208 = vmatpush1.bf16.msra.mxu1 %v1623_v18  ;;  %v809_v17 = vrot.slane %v804_v16, %v1913_v12  ;;  %v817_v18 = vrot.slane %v804_v16, %v1935_v28 }
 0x165   :  { %1168 = vmatprep.subr.bf16.mxu0 %v1628_v19  ;;  %1209 = vmatprep.subr.bf16.mxu1 %v1631_v20  ;;  %v1263_v19 = vld [vmem:[%s1973_s8] sm:$0xf]  ;;  %v813_v20 = vrot.slane %v804_v16, %v1921_v14 }
 0x168   :  { %1169 = vmatpush1.bf16.msra.mxu0 %v1626_v21  ;;  %1210 = vmatpush1.bf16.msra.mxu1 %v1629_v22  ;;  %v821_v21 = vrot.slane %v804_v16, %v1924_v15 }
 0x169   :  { %1170 = vmatprep.subr.bf16.mxu0 %v1634_v23  ;;  %1211 = vmatprep.subr.bf16.mxu1 %v1637_v25 }
 0x16c   :  { %1171 = vmatpush1.bf16.msra.mxu0 %v1632_v26  ;;  %1212 = vmatpush1.bf16.msra.mxu1 %v1635_v27  ;;  %v1268_v26 = vrot.slane %v1263_v19, %v1913_v12  ;;  %v1280_v12 = vrot.slane %v1263_v19, %v1924_v15 }
 0x16d   :  { %1172 = vmatprep.subr.bf16.mxu0 %v1640_v29  ;;  %1213 = vmatprep.subr.bf16.mxu1 %v1643_v30 }
 0x170   :  { %1173 = vmatpush1.bf16.msra.mxu0 %v1638_v31  ;;  %1214 = vmatpush1.bf16.msra.mxu1 %v1641_v32  ;;  %v1272_v32 = vrot.slane %v1263_v19, %v1921_v14 }
 0x171   :  { %1174 = vmatprep.subr.bf16.mxu0 %v1646_v34  ;;  %1215 = vmatprep.subr.bf16.mxu1 %v1649_v35 }
 0x174   :  { %1175 = vmatpush1.bf16.msra.mxu0 %v1644_v36  ;;  %1216 = vmatpush1.bf16.msra.mxu1 %v1647_v37 }
 0x175   :  { %1176 = vmatprep.subr.bf16.mxu0 %v1652_v38  ;;  %1217 = vmatprep.subr.bf16.mxu1 %v1655_v39  ;;  %v1276_v39 = vrot.slane %v1263_v19, %v1935_v28 }
 0x178   :  { %1177 = vmatpush1.bf16.msra.mxu0 %v1650_v40  ;;  %1218 = vmatpush1.bf16.msra.mxu1 %v1653_v41 }
 0x17b   :  { %1179 = vmatmul.mubr.bf16.vlgmr.msra.gmra.mrb[8].mxu0 %v246_v13  ;;  %1220 = vmatmul.mubr.bf16.vlgmr.msra.gmra.mrb[8].mxu1 %v246_v13 }
 0x20e   :  { %v688_v48 = vpop.f32.mrb[4].mxu0  ;;  %v729_v49 = vpop.f32.mrb[4].mxu1 }
 0x20f   :  { %v689_v50 = vadd.f32 %v688_v48, %v317_v44  ;;  %v730_v52 = vadd.f32 %v729_v49, %v325_v24  ;;  %v690_v53 = vpop.f32.mrb[5].mxu0  ;;  %v731_v54 = vpop.f32.mrb[5].mxu1 }
 0x210   :  { %v691_v55 = vadd.f32 %v690_v53, %v321_v46  ;;  %v732_v57 = vadd.f32 %v731_v54, %v329_v47  ;;  %v692_v58 = vpop.f32.mrb[6].mxu0  ;;  %v733_v59 = vpop.f32.mrb[6].mxu1  ;;  %v1449_v47 = vld [vmem:[#allocation9] ss:$0 sm:$0xff] }
 0x211   :  { %v736_v60 = vmax.f32 %v689_v50, 0.0  ;;  %v693_v61 = vpop.f32.mrb[7].mxu0  ;;  %v734_v62 = vpop.f32.mrb[7].mxu1  ;;  %v738_v63 = vmax.f32 %v730_v52, 0.0 }
 0x212   :  { %v737_v1 = vmax.f32 %v691_v55, 0.0  ;;  %v739_v4 = vmax.f32 %v732_v57, 0.0 }
 0x213   :  { %v1254_v2 = vmul.f32 %v1237_v51, %v736_v60  ;;  %v1256_v6 = vmul.f32 %v1245_v0, %v738_v63 }
 0x214   :  { %v1255_v3 = vmul.f32 %v1241_v56, %v737_v1  ;;  %v1257_v8 = vmul.f32 %v1249_v5, %v739_v4 }
 0x216   :  { %v1258_v7 = vadd.f32 %v1255_v3, %v1254_v2 }
 0x218   :  { %v1259_v9 = vadd.f32 %v1258_v7, %v1256_v6 }
 0x21a   :  { %v1260_v10 = vadd.f32 %v1259_v9, %v1257_v8 }
 0x21c   :  { %1261 = vadd.xlane.f32.xlu0 %v1260_v10 }
 0x24e   :  { %v1180_v22 = vpop.f32.mrb[8].mxu0  ;;  %v1221_v23 = vpop.f32.mrb[8].mxu1 }
 0x24f   :  { %v1181_v25 = vadd.f32 %v1180_v22, %v809_v17  ;;  %v1222_v27 = vadd.f32 %v1221_v23, %v817_v18  ;;  %v1182_v29 = vpop.f32.mrb[9].mxu0  ;;  %v1223_v30 = vpop.f32.mrb[9].mxu1 }
 0x250   :  { %v1183_v31 = vadd.f32 %v1182_v29, %v813_v20  ;;  %v1224_v33 = vadd.f32 %v1223_v30, %v821_v21  ;;  %v1184_v34 = vpop.f32.mrb[10].mxu0  ;;  %v1225_v35 = vpop.f32.mrb[10].mxu1 }
 0x251   :  { %v1228_v36 = vmax.f32 %v1181_v25, 0.0  ;;  %v1185_v37 = vpop.f32.mrb[11].mxu0  ;;  %v1226_v11 = vpop.f32.mrb[11].mxu1  ;;  %v1230_v38 = vmax.f32 %v1222_v27, 0.0 }
 0x252   :  { %v1229_v40 = vmax.f32 %v1183_v31, 0.0  ;;  %v1231_v13 = vmax.f32 %v1224_v33, 0.0 }
 0x253   :  { %v1285_v41 = vmul.f32 %v1268_v26, %v1228_v36  ;;  %v1287_v43 = vmul.f32 %v1276_v39, %v1230_v38 }
 0x254   :  { %v1286_v42 = vmul.f32 %v1272_v32, %v1229_v40  ;;  %v1288_v24 = vmul.f32 %v1280_v12, %v1231_v13 }
 0x256   :  { %v1289_v44 = vadd.f32 %v1286_v42, %v1285_v41 }
 0x258   :  { %v1290_v45 = vadd.f32 %v1289_v44, %v1287_v43 }
 0x25a   :  { %v1291_v14 = vadd.f32 %v1290_v45, %v1288_v24 }
 0x25c   :  { %1292 = vadd.xlane.f32.xlu0 %v1291_v14 }
 0x2a9   :  { %v1262_v46 = vpop.xlane.xlu0 %1261 }
 0x2e9   :  { %v1293_v48 = vpop.xlane.xlu0 %1292 }
 0x2ea   :  { %v1295_v49 = vsel %vm1294_vm2, %v1262_v46, %v1293_v48 }
 0x2eb   :  { %v1303_v50 = vadd.f32 %v1449_v47, %v1295_v49 }
 0x2ed   :  { %1305 = vst.msk [vmem:[%s1975_s10] sm:$0xff] %vm1304_vm3, %v1303_v50 }
 0x2ee   :  { %1310 = vsyncpa [#allocation3], 1 }
 0x2ef   :  { %1311 = vsyncpa [#allocation5], 1 }
 0x2f0   :  { %1312 = vsyncpa [#allocation8], 1 }

</bundles_post_ra>
